<compile_context>
chip_gen: v6e
topology: v6e:2x2x1
jax: 0.10.0
libtpu: 0.0.40
codegen_flags: <defaults>
</compile_context>

<pallas_src>
import functools

import jax
import jax.numpy as jnp
from jax.experimental import pallas as pl
from jax.experimental.pallas import tpu as pltpu


# --------------------------------------------------------------------------
# helpers
# --------------------------------------------------------------------------
def _round_up(x, m):
    return ((int(x) + m - 1) // m) * m


def _lane_pad(x):
    return _round_up(max(int(x), 1), 128)


def _sublane_pad(rows, itemsize):
    mult = 8 if itemsize >= 4 else 8 * (4 // itemsize)   # 8 for f32, 16 for bf16
    return _round_up(max(int(rows), 1), mult)


def _vmem_capacity_bytes():
    try:
        cap = getattr(pltpu.get_tpu_info(), "vmem_capacity_bytes", None)
        if cap:
            return int(cap)
    except Exception:
        pass
    return 64 * 1024 * 1024   # conservative default: v7x per-TensorCore VMEM


def _num_tensorcores():
    try:
        kind = jax.devices()[0].device_kind.lower()
    except Exception:
        return 2
    single_tc = ("v2", "v3", "v5 lite", "v5e", "v5litepod", "v6 lite", "v6e")
    if any(tag in kind for tag in single_tc):
        return 1
    return 2   # v4/v5p megacore, v7x: prefer an even number of batch grid steps


def _vmem_footprint_bytes(bb, tn, *, M, Dq, Dc, dq_pad, itemsize):
    """Padding-aware per-grid-step VMEM estimate (lane pad to 128, sublane pad)."""
    f32 = 4
    two_dc = 2 * Dc
    sp_c = lambda r: _sublane_pad(r, itemsize)   # compute-dtype rows
    sp_f = lambda r: _sublane_pad(r, f32)        # f32 rows
    # double-buffered pipeline blocks (inputs + output)
    pp_blk = 2 * itemsize * bb * sp_c(tn) * _lane_pad(Dq)
    ikv_blk = 2 * itemsize * sp_c(bb * M) * _lane_pad(two_dc)
    w_blk = 2 * itemsize * (sp_c(Dq) * _lane_pad(two_dc)
                            + sp_c(two_dc) * _lane_pad(two_dc)
                            + sp_c(two_dc) * _lane_pad(dq_pad))
    b_blk = 2 * f32 * sp_f(1) * _lane_pad(dq_pad)
    out_blk = 2 * f32 * bb * sp_f(tn) * _lane_pad(dq_pad)
    # persistent scratch: packed [k|v] projection in the compute dtype
    scr = itemsize * sp_c(bb * M) * _lane_pad(two_dc)
    # live temporaries: f32 accumulators + compute-dtype copies (upper bound)
    rows_f = bb * sp_f(tn)
    temps = f32 * (rows_f * (_lane_pad(two_dc)              # q
                             + 2 * _lane_pad(M)             # scores + e
                             + _lane_pad(two_dc)            # o
                             + _lane_pad(dq_pad))           # res
                   + sp_f(bb * M) * _lane_pad(two_dc))      # kv (f32, at n == 0)
    temps += itemsize * bb * sp_c(tn) * (2 * _lane_pad(two_dc) + _lane_pad(M))
    return pp_blk + ikv_blk + w_blk + b_blk + out_blk + scr + temps


def _choose_tiling(B, N, M, Dq, Dc, dq_pad, itemsize, vmem_budget, num_tc):
    """Pick (batch_block, n_block): biggest tiles that fit, TC-count aware."""
    tn_cands = [t for t in range(N, 0, -1) if N % t == 0 and (t == N or t % 8 == 0)]
    bb_cands = [b for b in range(B, 0, -1) if B % b == 0]

    def block_shape_ok(bb):
        return bb == B or (bb * M) % 8 == 0

    def fits(bb, tn):
        return _vmem_footprint_bytes(bb, tn, M=M, Dq=Dq, Dc=Dc,
                                     dq_pad=dq_pad, itemsize=itemsize) <= vmem_budget

    # Pass 1: honor the multi-TensorCore preference (even split of batch steps);
    # Pass 2: drop it (single-TC parts take the single largest fitting block).
    for honor_tc in (True, False):
        for tn in tn_cands:
            for bb in bb_cands:
                if honor_tc and num_tc > 1 and (B // bb) % num_tc != 0:
                    continue
                if not block_shape_ok(bb):
                    continue
                if fits(bb, tn):
                    return bb, tn
    return 1, tn_cands[-1]


# --------------------------------------------------------------------------
# kernel
# --------------------------------------------------------------------------
def _attention_kernel(pp_ref, ikv_ref, wq_ref, wkv_ref, wo_ref, bo_ref,
                      out_ref, kv_scr, *, bb, tn, m, approx_recip):
    cd = pp_ref.dtype                    # MXU-operand compute dtype (bf16 or f32)
    dq = pp_ref.shape[-1]
    two_dc = kv_scr.shape[-1]
    dq_pad = out_ref.shape[-1]

    # ---- packed [k | v] projection: once per batch block, reused by all N tiles ----
    @pl.when(pl.program_id(1) == 0)
    def _project_kv():
        kv = jnp.dot(ikv_ref[...], wkv_ref[...],
                     preferred_element_type=jnp.float32)            # (Bb*M, 2*Dc)
        kv_scr[...] = kv.astype(cd)

    # ---- q projection (softmax scale folded into Wq; right half zero-padded) ----
    pp2 = pp_ref[...].reshape(bb * tn, dq)
    q = jnp.dot(pp2, wq_ref[...], preferred_element_type=jnp.float32)  # (Bb*Tn, 2*Dc)
    qb = q.astype(cd).reshape(bb, tn, two_dc)
    kvb = kv_scr[...].reshape(bb, m, two_dc)

    # ---- scores = einsum('bnd,bmd->bnm'); the zero q-half contributes exactly 0 ----
    scores = jax.lax.dot_general(
        qb, kvb, dimension_numbers=(((2,), (2,)), ((0,), (0,))),
        preferred_element_type=jnp.float32)                          # (Bb, Tn, M) f32

    # ---- softmax in f32; normalization deferred until after attn @ v ----
    smax = jnp.max(scores, axis=-1, keepdims=True)
    e = jnp.exp(scores - smax)
    denom = jnp.sum(e, axis=-1, keepdims=True)

    # o = e @ [k | v]; the k-half is discarded by the zero rows of the padded Wo
    o = jax.lax.dot_general(
        e.astype(cd), kvb, dimension_numbers=(((2,), (1,)), ((0,), (0,))),
        preferred_element_type=jnp.float32)                          # (Bb, Tn, 2*Dc)
    o = o * pl.reciprocal(denom, approx=approx_recip)                # 2*Dc wide, not M wide

    # ---- output projection + bias; lane-dense (dq_pad) store ----
    res = jnp.dot(o.reshape(bb * tn, two_dc).astype(cd), wo_ref[...],
                  preferred_element_type=jnp.float32)                # (Bb*Tn, dq_pad)
    res = res + bo_ref[...]
    out_ref[...] = res.reshape(bb, tn, dq_pad).astype(out_ref.dtype)


# --------------------------------------------------------------------------
# wrapper
# --------------------------------------------------------------------------
def attention_pallas(point_public, image_public, image_private,
                     wq, wk, wv, wo, bo, *, dim_head,
                     compute_dtype=jnp.bfloat16,
                     batch_block=None, n_block=None):
    B, N, Dq = point_public.shape
    B2, M, Dc = image_public.shape
    assert B2 == B and image_private.shape == (B, M, Dc)
    inner = wq.shape[1]
    assert inner == Dc, "module einsum 'bnc,bmc->bnm' requires inner_dim == context_dim"
    out_dtype = point_public.dtype
    scale = float(dim_head) ** (-0.5)

    cd = jnp.dtype(compute_dtype)
    # NOTE (v5e): if profiling shows VALU saturation, use compute_dtype=float32
    # (v5e's VPU has no bf16, so every astype(bf16) costs pack/unpack VALU work).
    approx_recip = cd == jnp.dtype(jnp.bfloat16)
    itemsize = cd.itemsize
    f32 = jnp.float32

    dq_pad = _lane_pad(Dq)          # lane-dense output columns (no-op when Dq % 128 == 0)
    two_dc = 2 * Dc

    # ---- wrapper-side packing / padding (fuses with the dtype cast; weights tiny) ----
    pp = point_public.astype(cd)                                           # (B, N, Dq)
    ikv = jnp.concatenate([image_public.reshape(B * M, Dc),
                           image_private.reshape(B * M, Dc)],
                          axis=-1).astype(cd)                              # (B*M, 2*Dc)
    # softmax scale folded into Wq; zero right half keeps q aligned with [k | v]
    wq_p = jnp.concatenate([wq.astype(f32) * scale,
                            jnp.zeros((Dq, Dc), f32)], axis=1).astype(cd)  # (Dq, 2*Dc)
    zdc = jnp.zeros((Dc, Dc), f32)
    wkv = jnp.concatenate([jnp.concatenate([wk.astype(f32), zdc], axis=1),
                           jnp.concatenate([zdc, wv.astype(f32)], axis=1)],
                          axis=0).astype(cd)                               # (2*Dc, 2*Dc)
    # zero top half selects the v-part of attn @ [k|v]; columns padded to dq_pad
    wo_p = jnp.concatenate(
        [jnp.zeros((Dc, dq_pad), f32),
         jnp.zeros((inner, dq_pad), f32).at[:, :Dq].set(wo.astype(f32))],
        axis=0).astype(cd)                                                 # (2*Dc, dq_pad)
    bo_p = jnp.zeros((1, dq_pad), f32).at[:, :Dq].set(
        jnp.asarray(bo, f32).reshape(1, Dq))                               # (1, dq_pad)

    # ---- generation-aware tiling / VMEM sizing ----
    vmem_cap = _vmem_capacity_bytes()
    vmem_limit = (vmem_cap * 3) // 4            # ~96 MiB on v5e/v6e, ~48 MiB on v7x
    budget = max(vmem_limit - 8 * 1024 * 1024, (vmem_limit * 3) // 4)
    num_tc = _num_tensorcores()
    bb_auto, tn_auto = _choose_tiling(B, N, M, Dq, Dc, dq_pad, itemsize, budget, num_tc)
    Bb = batch_block if batch_block is not None else bb_auto
    Tn = n_block if n_block is not None else tn_auto
    assert B % Bb == 0 and N % Tn == 0
    grid = (B // Bb, N // Tn)

    kernel = functools.partial(_attention_kernel, bb=Bb, tn=Tn, m=M,
                               approx_recip=approx_recip)

    out = pl.pallas_call(
        kernel,
        out_shape=jax.ShapeDtypeStruct((B, N, dq_pad), out_dtype),
        grid_spec=pltpu.PrefetchScalarGridSpec(
            num_scalar_prefetch=0,
            grid=grid,
            in_specs=[
                pl.BlockSpec((Bb, Tn, Dq), lambda g, n: (g, n, 0)),        # point_public
                pl.BlockSpec((Bb * M, two_dc), lambda g, n: (g, 0)),       # [img_pub|img_priv]
                pl.BlockSpec((Dq, two_dc), lambda g, n: (0, 0)),           # Wq (scaled, padded)
                pl.BlockSpec((two_dc, two_dc), lambda g, n: (0, 0)),       # blockdiag(Wk, Wv)
                pl.BlockSpec((two_dc, dq_pad), lambda g, n: (0, 0)),       # [0 ; Wo] (padded)
                pl.BlockSpec((1, dq_pad), lambda g, n: (0, 0)),            # bias (padded)
            ],
            out_specs=pl.BlockSpec((Bb, Tn, dq_pad), lambda g, n: (g, n, 0)),
            scratch_shapes=[pltpu.VMEM((Bb * M, two_dc), cd)],             # resident [k|v]
        ),
        compiler_params=pltpu.CompilerParams(
            dimension_semantics=("parallel", "arbitrary"),
            vmem_limit_bytes=int(vmem_limit)),
    )(pp, ikv, wq_p, wkv, wo_p, bo_p)

    return out if dq_pad == Dq else out[..., :Dq]


# --------------------------------------------------------------------------
# pure-JAX reference
# --------------------------------------------------------------------------
def attention_reference(point_public, image_public, image_private,
                        wq, wk, wv, wo, bo, *, dim_head):
    scale = float(dim_head) ** (-0.5)
    q = point_public @ wq
    k = image_public @ wk
    v = image_private @ wv
    scores = jnp.einsum('bnc,bmc->bnm', q, k) * scale
    attn = jax.nn.softmax(scores, axis=-1)
    out = attn @ v
    return out @ wo + bo


if __name__ == "__main__":
    # Small shapes consistent with the module (inner_dim == context_dim).
    B, N, M = 4, 32, 24
    query_dim = 32       # PC channels
    context_dim = 16     # image channels
    heads = 1
    dim_head = 16        # "Ct"
    inner_dim = heads * dim_head   # == context_dim

    key = jax.random.PRNGKey(0)
    ks = jax.random.split(key, 8)
    point_public = jax.random.normal(ks[0], (B, N, query_dim), jnp.float32)
    image_public = jax.random.normal(ks[1], (B, M, context_dim), jnp.float32)
    image_private = jax.random.normal(ks[2], (B, M, context_dim), jnp.float32)
    wq = 0.1 * jax.random.normal(ks[3], (query_dim, inner_dim), jnp.float32)
    wk = 0.1 * jax.random.normal(ks[4], (context_dim, context_dim), jnp.float32)
    wv = 0.1 * jax.random.normal(ks[5], (context_dim, context_dim), jnp.float32)
    wo = 0.1 * jax.random.normal(ks[6], (inner_dim, query_dim), jnp.float32)
    bo = 0.1 * jax.random.normal(ks[7], (1, query_dim), jnp.float32)

    ref = attention_reference(point_public, image_public, image_private,
                              wq, wk, wv, wo, bo, dim_head=dim_head)

    # 1) exact f32 path, automatic tiling (tight check vs. the reference)
    out_f32 = jax.block_until_ready(
        attention_pallas(point_public, image_public, image_private,
                         wq, wk, wv, wo, bo, dim_head=dim_head,
                         compute_dtype=jnp.float32))
    assert out_f32.shape == (B, N, query_dim)
    assert jnp.allclose(out_f32, ref, atol=1e-4, rtol=1e-4), "f32 mismatch vs reference"

    # 2) exact f32 path, forced multi-tile grid (2 batch steps x 4 N tiles):
    #    exercises the per-batch [k|v] scratch reuse across N tiles.
    out_tiled = jax.block_until_ready(
        attention_pallas(point_public, image_public, image_private,
                         wq, wk, wv, wo, bo, dim_head=dim_head,
                         compute_dtype=jnp.float32, batch_block=2, n_block=8))
    assert out_tiled.shape == (B, N, query_dim)
    assert jnp.allclose(out_tiled, ref, atol=1e-4, rtol=1e-4), "tiled mismatch vs reference"

    # 3) fast path: bf16 MXU operands + approx reciprocal, f32 accumulation.
    out_bf16 = jax.block_until_ready(
        attention_pallas(point_public, image_public, image_private,
                         wq, wk, wv, wo, bo, dim_head=dim_head,
                         compute_dtype=jnp.bfloat16))
    assert out_bf16.shape == (B, N, query_dim)
    assert jnp.allclose(out_bf16, ref, atol=5e-2, rtol=5e-2), "bf16 mismatch vs reference"

    print("KERNEL_OK")
</pallas_src>

<mosaic_0001>
module attributes {stable_mosaic.version = 11 : i64} {
  func.func @_attention_kernel(%arg0: i32, %arg1: i32, %arg2: memref<2x32x32xf32, #tpu.memory_space<vmem>>, %arg3: memref<48x32xf32, #tpu.memory_space<vmem>>, %arg4: memref<32x32xf32, #tpu.memory_space<vmem>>, %arg5: memref<32x32xf32, #tpu.memory_space<vmem>>, %arg6: memref<32x128xf32, #tpu.memory_space<vmem>>, %arg7: memref<1x128xf32, #tpu.memory_space<vmem>>, %arg8: memref<2x32x128xf32, #tpu.memory_space<vmem>>, %arg9: memref<48x32xf32, #tpu.memory_space<vmem>>) attributes {dimension_semantics = [#tpu.dimension_semantics<parallel>, #tpu.dimension_semantics<arbitrary>], iteration_bounds = array<i64: 2, 1>, scalar_prefetch = 0 : i64, scratch_operands = 1 : i64, tpu.core_type = #tpu.core_type<tc>, window_params = [{transform_indices = @transform_0, window_bounds = array<i64: 2, 32, 32>}, {transform_indices = @transform_1, window_bounds = array<i64: 48, 32>}, {pipeline_mode = #tpu.pipeline_mode<synchronous>, transform_indices = @transform_2, window_bounds = array<i64: 32, 32>}, {pipeline_mode = #tpu.pipeline_mode<synchronous>, transform_indices = @transform_3, window_bounds = array<i64: 32, 32>}, {pipeline_mode = #tpu.pipeline_mode<synchronous>, transform_indices = @transform_4, window_bounds = array<i64: 32, 128>}, {pipeline_mode = #tpu.pipeline_mode<synchronous>, transform_indices = @transform_5, window_bounds = array<i64: 1, 128>}, {transform_indices = @transform_6, window_bounds = array<i64: 2, 32, 128>}]} {
    %c0_i32 = arith.constant 0 : i32
    %0 = arith.cmpi eq, %arg1, %c0_i32 : i32
    %1 = arith.extui %0 : i1 to i32
    %c0_i32_0 = arith.constant 0 : i32
    %2 = arith.cmpi ne, %1, %c0_i32_0 : i32
    scf.if %2 {
      %c0_19 = arith.constant 0 : index
      %c0_20 = arith.constant 0 : index
      %30 = vector.load %arg3[%c0_19, %c0_20] : memref<48x32xf32, #tpu.memory_space<vmem>>, vector<48x32xf32>
      %c0_21 = arith.constant 0 : index
      %c0_22 = arith.constant 0 : index
      %31 = vector.load %arg5[%c0_21, %c0_22] : memref<32x32xf32, #tpu.memory_space<vmem>>, vector<32x32xf32>
      %cst_23 = arith.constant dense<0.000000e+00> : vector<48x32xf32>
      %32 = tpu.matmul %30, %31, %cst_23 {dimension_numbers = #tpu.dot_dimension_numbers<[1], [0], [0], [1], [0, 0, 1, 1], [], []>} : vector<48x32xf32>, vector<32x32xf32>, vector<48x32xf32> -> vector<48x32xf32>
      %c0_24 = arith.constant 0 : index
      %c0_25 = arith.constant 0 : index
      %33 = vector.load %arg9[%c0_24, %c0_25] : memref<48x32xf32, #tpu.memory_space<vmem>>, vector<48x32xf32>
      tpu.vector_store %arg9[%c0_24, %c0_25], %32 {strides = array<i32>} : memref<48x32xf32, #tpu.memory_space<vmem>>, vector<48x32xf32>,
    } else {
    }
    %c0 = arith.constant 0 : index
    %c0_1 = arith.constant 0 : index
    %c0_2 = arith.constant 0 : index
    %3 = vector.load %arg2[%c0, %c0_1, %c0_2] : memref<2x32x32xf32, #tpu.memory_space<vmem>>, vector<2x32x32xf32>
    %4 = vector.shape_cast %3 : vector<2x32x32xf32> to vector<64x32xf32>
    %c0_3 = arith.constant 0 : index
    %c0_4 = arith.constant 0 : index
    %5 = vector.load %arg4[%c0_3, %c0_4] : memref<32x32xf32, #tpu.memory_space<vmem>>, vector<32x32xf32>
    %cst = arith.constant dense<0.000000e+00> : vector<64x32xf32>
    %6 = tpu.matmul %4, %5, %cst {dimension_numbers = #tpu.dot_dimension_numbers<[1], [0], [0], [1], [0, 0, 1, 1], [], []>} : vector<64x32xf32>, vector<32x32xf32>, vector<64x32xf32> -> vector<64x32xf32>
    %7 = vector.shape_cast %6 : vector<64x32xf32> to vector<2x32x32xf32>
    %c0_5 = arith.constant 0 : index
    %c0_6 = arith.constant 0 : index
    %8 = vector.load %arg9[%c0_5, %c0_6] : memref<48x32xf32, #tpu.memory_space<vmem>>, vector<48x32xf32>
    %9 = vector.shape_cast %8 : vector<48x32xf32> to vector<2x24x32xf32>
    %cst_7 = arith.constant dense<0.000000e+00> : vector<2x32x24xf32>
    %10 = tpu.matmul %7, %9, %cst_7 {dimension_numbers = #tpu.dot_dimension_numbers<[2], [2], [1], [1], [0, 0, 0, 1, 1, 1], [0], [0]>} : vector<2x32x32xf32>, vector<2x24x32xf32>, vector<2x32x24xf32> -> vector<2x32x24xf32>
    %cst_8 = arith.constant dense<0xFF800000> : vector<2x32xf32>
    %11 = vector.multi_reduction <maximumf>, %10, %cst_8 [2] : vector<2x32x24xf32> to vector<2x32xf32>
    %12 = vector.shape_cast %11 : vector<2x32xf32> to vector<2x32x1xf32>
    %13 = vector.broadcast %12 : vector<2x32x1xf32> to vector<2x32x24xf32>
    %14 = arith.subf %10, %13 : vector<2x32x24xf32>
    %15 = math.exp %14 : vector<2x32x24xf32>
    %cst_9 = arith.constant dense<0.000000e+00> : vector<2x32xf32>
    %16 = vector.multi_reduction <add>, %15, %cst_9 [2] : vector<2x32x24xf32> to vector<2x32xf32>
    %17 = vector.shape_cast %16 : vector<2x32xf32> to vector<2x32x1xf32>
    %cst_10 = arith.constant dense<0.000000e+00> : vector<2x32x32xf32>
    %18 = tpu.matmul %15, %9, %cst_10 {dimension_numbers = #tpu.dot_dimension_numbers<[2], [1], [1], [2], [0, 0, 0, 1, 1, 2], [0], [0]>} : vector<2x32x24xf32>, vector<2x24x32xf32>, vector<2x32x32xf32> -> vector<2x32x32xf32>
    %19 = tpu.reciprocal %17 : vector<2x32x1xf32> -> vector<2x32x1xf32>
    %20 = vector.broadcast %19 : vector<2x32x1xf32> to vector<2x32x32xf32>
    %21 = arith.mulf %18, %20 : vector<2x32x32xf32>
    %22 = vector.shape_cast %21 : vector<2x32x32xf32> to vector<64x32xf32>
    %c0_11 = arith.constant 0 : index
    %c0_12 = arith.constant 0 : index
    %23 = vector.load %arg6[%c0_11, %c0_12] : memref<32x128xf32, #tpu.memory_space<vmem>>, vector<32x128xf32>
    %cst_13 = arith.constant dense<0.000000e+00> : vector<64x128xf32>
    %24 = tpu.matmul %22, %23, %cst_13 {dimension_numbers = #tpu.dot_dimension_numbers<[1], [0], [0], [1], [0, 0, 1, 1], [], []>} : vector<64x32xf32>, vector<32x128xf32>, vector<64x128xf32> -> vector<64x128xf32>
    %c0_14 = arith.constant 0 : index
    %c0_15 = arith.constant 0 : index
    %25 = vector.load %arg7[%c0_14, %c0_15] : memref<1x128xf32, #tpu.memory_space<vmem>>, vector<1x128xf32>
    %26 = vector.broadcast %25 : vector<1x128xf32> to vector<64x128xf32>
    %27 = arith.addf %24, %26 : vector<64x128xf32>
    %28 = vector.shape_cast %27 : vector<64x128xf32> to vector<2x32x128xf32>
    %c0_16 = arith.constant 0 : index
    %c0_17 = arith.constant 0 : index
    %c0_18 = arith.constant 0 : index
    %29 = vector.load %arg8[%c0_16, %c0_17, %c0_18] : memref<2x32x128xf32, #tpu.memory_space<vmem>>, vector<2x32x128xf32>
    tpu.vector_store %arg8[%c0_16, %c0_17, %c0_18], %28 {strides = array<i32>} : memref<2x32x128xf32, #tpu.memory_space<vmem>>, vector<2x32x128xf32>,
    return
  }
  func.func @transform_0(%arg0: i32, %arg1: i32) -> (i32, i32, i32) {
    %c0_i32 = arith.constant 0 : i32
    %c0_i32_0 = arith.constant 0 : i32
    return %arg0, %arg1, %c0_i32 : i32, i32, i32
  }
  func.func @transform_1(%arg0: i32, %arg1: i32) -> (i32, i32) {
    %c0_i32 = arith.constant 0 : i32
    %c0_i32_0 = arith.constant 0 : i32
    return %arg0, %c0_i32 : i32, i32
  }
  func.func @transform_2(%arg0: i32, %arg1: i32) -> (i32, i32) {
    %c0_i32 = arith.constant 0 : i32
    %c0_i32_0 = arith.constant 0 : i32
    %c0_i32_1 = arith.constant 0 : i32
    return %c0_i32, %c0_i32_0 : i32, i32
  }
  func.func @transform_3(%arg0: i32, %arg1: i32) -> (i32, i32) {
    %c0_i32 = arith.constant 0 : i32
    %c0_i32_0 = arith.constant 0 : i32
    %c0_i32_1 = arith.constant 0 : i32
    return %c0_i32, %c0_i32_0 : i32, i32
  }
  func.func @transform_4(%arg0: i32, %arg1: i32) -> (i32, i32) {
    %c0_i32 = arith.constant 0 : i32
    %c0_i32_0 = arith.constant 0 : i32
    %c0_i32_1 = arith.constant 0 : i32
    return %c0_i32, %c0_i32_0 : i32, i32
  }
  func.func @transform_5(%arg0: i32, %arg1: i32) -> (i32, i32) {
    %c0_i32 = arith.constant 0 : i32
    %c0_i32_0 = arith.constant 0 : i32
    %c0_i32_1 = arith.constant 0 : i32
    return %c0_i32, %c0_i32_0 : i32, i32
  }
  func.func @transform_6(%arg0: i32, %arg1: i32) -> (i32, i32, i32) {
    %c0_i32 = arith.constant 0 : i32
    %c0_i32_0 = arith.constant 0 : i32
    return %arg0, %arg1, %c0_i32 : i32, i32, i32
  }
}

</mosaic_0001>

<bundles_post_ra>
// kernel: tpu_custom_call.1
= control target key start
LH: loop header
LB: loop body
LE: loop exit
PB: predicated region body
PF: predicated region fallthrough
CT: control target
= control target key end

     0   :  { %11 = vsyncpa [#allocation4], 0  ;;  %s2267_s0 = inlined_call_operand.vmem [shape: f32[4,32,32], index: 0, kind: input, shape index: {}]   ;;  %s2268_s1 = inlined_call_operand.vmem [shape: f32[96,32], index: 1, kind: input, shape index: {}]   ;;  %s2269_s2 = inlined_call_operand.hbm [shape: f32[32,32], index: 2, kind: input, shape index: {}]   ;;  %s2270_s3 = inlined_call_operand.hbm [shape: f32[32,32], index: 3, kind: input, shape index: {}]   ;;  %s2271_s4 = inlined_call_operand.hbm [shape: f32[32,128], index: 4, kind: input, shape index: {}]   ;;  %s2272_s5 = inlined_call_operand.vmem [shape: f32[1,128], index: 5, kind: input, shape index: {}]   ;;  %s2273_s6 = inlined_call_operand.hbm [shape: f32[4,32,128], index: 6, kind: output, shape index: {}]  }
   0x1   :  { %12 = vsyncpa [#allocation7], 0 }
   0x2   :  { %13 = vsyncpa [#allocation5], 0 }
   0x3   :  { %15 = vsyncpa [#allocation5 + $0x1], 0  ;;  %s1983_s21 = smov 0   ;;  %s1985_s22 = smov 0  }
   0x4   :  { %s1987_s23 = smov 0   ;;  %s1989_s24 = smov 0  }
   0x5   :  { %s1991_s25 = smov 0   ;;  %s1993_s26 = smov 0  }
   0x6 LB: > { %s1417_s27 = sadd.s32 4294967295, %s1938_s26   ;;  %s1418_s28 = sadd.s32 4294967294, %s1938_s26   ;;  %s1938_s26 = sphi %s1993_s26, %s21_s26   ;;  %s1934_s25 = sphi %s1991_s25, %s2284_s25   ;;  %s1930_s24 = sphi %s1989_s24, %s2283_s24   ;;  %s1926_s23 = sphi %s1987_s23, %s2282_s23   ;;  %s1922_s22 = sphi %s1985_s22, %s2281_s22   ;;  %s1918_s21 = sphi %s1983_s21, %s2280_s21  }
   0x7   : > { %s33_s29 = sadd.s32 1, %s1934_s25  ;;  %s180_s30 = sadd.s32 1, %s1926_s23 }
   0x8   : > { %p35_p0 = scmp.ge.s32.totalorder %s33_s29, 2  ;;  %p190_p1 = scmp.ne.s32.totalorder %s1926_s23, %s1922_s22 }
   0x9   : > { %p191_p2 = scmp.eq.s32.totalorder %s1417_s27, 1  ;;  %p196_p3 = scmp.ne.s32.totalorder %s1922_s22, %s1918_s21 }
   0xa   : > { %s2286_s29 = smov (%p35_p0, %s33_s29), 0  ;;  %p197_p5 = scmp.eq.s32.totalorder %s1418_s28, 1 }
   0xb   : > { %p2023_p4 = por %p191_p2, %p190_p1  ;;  %s175_s8 = ssub.s32 %s1934_s25, %s2286_s29 }
   0xc   : > { %p1419_p6 = scmp.ge.s32.totalorder %s1938_s26, 1  ;;  %p178_p7 = scmp.eq.s32.totalorder %s175_s8, 0 }
   0xd   : > { %p2030_p8 = por %p197_p5, %p196_p3  ;;  %p204_p9 = scmp.lt.s32.totalorder %s1938_s26, 3 }
   0xe   : > { %s2036_s10 = scalar_select %p178_p7, %s1926_s23, %s180_s30  }
   0xf   : > { %s2275_s9 = scalar_select %p2030_p8, 1, 0 }
  0x10   : > { %p2038_p10 = pnand %p1419_p6, %p204_p9  ;;  %p2042_p11 = scmp.eq.s32.totalorder %s1417_s27, 0 }
  0x11   : > { %s1940_s13 = smov [#allocation6]   ;;  %s1941_s16 = smov [#allocation3]  }
  0x12   : > { %p1668_p12 = pneg %p2038_p10  ;;  %s229_s14 = sshll.u32 %s1940_s13, 4  ;;  %s230_s14 = int_to_ptr.vmem [resolvable:$true] %s229_s14 }
  0x13   : > { %s216_s17 = sshll.u32 %s1941_s16, 4  ;;  %s1787_s18 = scalar_lea.vmem %s230_s14, 512  ;;  %s217_s17 = int_to_ptr.vmem [resolvable:$true] %s216_s17 }
  0x14   : > { %p2050_p13 = pnand %p2042_p11, %p1668_p12  ;;  %p1788_p1 = scmp.ne.s32.totalorder %s230_s14, %s1787_s18 }
  0x15   : > { %p1795_p5 = scmp.lt.s32.totalorder %s230_s14, %s230_s14  ;;  %p1796_p6 = scmp.lt.s32.totalorder %s1787_s18, %s1787_s18 }
  0x16   : > { %p1778_p0 = pneg %p2050_p13 }
  0x17   : > { %p1797_p7 = por %p1796_p6, %p1795_p5 }
  0x18   : > { %p1790_p2 = pnand %p1788_p1, %p1778_p0 }
  0x1a   : > { %p1791_p3 = pneg %p1790_p2 }
  0x1c   : > { %p1798_p9 = pnand %p1797_p7, %p1791_p3 }
  0x1e   : > { %1801 = shalt.err (!%p1798_p9)
}
  0x1f   : > { %s1942_s19 = smov 128   ;;  %s1943_s20 = smov 8  }
  0x20   : > { %1674 = dma.hbm_to_vmem [thread:$0]  (!%p2050_p13), %s2270_s3, 512, %s230_s14, [#allocation7], %s1942_s19, %s1942_s19, %s1943_s20  }
  0x21   : > { %s1813_s30 = scalar_lea.vmem %s217_s17, 512  ;;  %p1821_p8 = scmp.lt.s32.totalorder %s217_s17, %s217_s17 }
  0x22   : > { %p1814_p12 = scmp.ne.s32.totalorder %s217_s17, %s1813_s30  ;;  %p1822_p5 = scmp.lt.s32.totalorder %s1813_s30, %s1813_s30 }
  0x24   : > { %p1816_p1 = pnand %p1814_p12, %p1778_p0  ;;  %p1823_p3 = por %p1822_p5, %p1821_p8 }
  0x26   : > { %p1817_p2 = pneg %p1816_p1 }
  0x28   : > { %p1824_p6 = pnand %p1823_p3, %p1817_p2 }
  0x2a   : > { %1827 = shalt.err (!%p1824_p6)
}
  0x2b   : > { %1671 = dma.hbm_to_vmem [thread:$0]  (!%p2050_p13), %s2269_s2, 512, %s217_s17, [#allocation4], %s1942_s19, %s1942_s19, %s1943_s20  }
  0x2c   : > { %s1944_s14 = smov [#allocation8]  }
  0x2d   : > { %s242_s16 = sshll.u32 %s1944_s14, 4  ;;  %s243_s16 = int_to_ptr.vmem [resolvable:$true] %s242_s16 }
  0x2e   : > { %s1839_s18 = scalar_lea.vmem %s243_s16, 512  ;;  %p1847_p1 = scmp.lt.s32.totalorder %s243_s16, %s243_s16 }
  0x2f   : > { %p1840_p7 = scmp.ne.s32.totalorder %s243_s16, %s1839_s18  ;;  %p1848_p8 = scmp.lt.s32.totalorder %s1839_s18, %s1839_s18 }
  0x31   : > { %p1842_p9 = pnand %p1840_p7, %p1778_p0  ;;  %p1849_p2 = por %p1848_p8, %p1847_p1 }
  0x33   : > { %p1843_p12 = pneg %p1842_p9 }
  0x35   : > { %p1850_p5 = pnand %p1849_p2, %p1843_p12 }
  0x37   : > { %1853 = shalt.err (!%p1850_p5)
}
  0x38   : > { %1677 = dma.hbm_to_vmem [thread:$0]  (!%p2050_p13), %s2271_s4, 512, %s243_s16, [#allocation7], %s1942_s19, %s1942_s19, %s1943_s20  }
  0x39   : > { %285 = sbr.rel (%p2038_p10) target bundleno = 1070 (0x42e), region = 44 }
  0x3e   : > { %1905 = dma.done.wait (%p2042_p11), [#allocation4], 512  }
  0x3f   : > { %1907 = vsyncadd (%p2042_p11), [#allocation4], 4294966784 }
  0x40   : > { %1909 = dma.done.wait (%p2042_p11), [#allocation7], 1024  }
  0x41   : > { %1911 = vsyncadd (%p2042_p11), [#allocation7], 4294966272  ;;  %s345_s15 = smul.u32 6, %s1930_s24  ;;  %s1429_s17 = sshll.u32 %s1930_s24, 1  ;;  %vm367_vm0 = vcmask 261120   ;;  %v366_v0 = vld [vmem:[#allocation6 + $0x18] sm:$0xff] }
  0x42   : > { %p335_p13 = scmp.lt.s32.totalorder %s1429_s17, 3  ;;  %v365_v1 = vld [vmem:[#allocation6 + $0x10] sm:$0xff]  ;;  %1549 = vmatprep.subr.mxu0 %v366_v0  ;;  %v364_v3 = vld [vmem:[#allocation6 + $0x8] sm:$0xff]  ;;  %v498_v4 = vld [vmem:[#allocation3 + $0x18] sm:$0xff]  ;;  %vm847_vm1 = vcmask 195584   ;;  %s330_s16 = sand.u32 1, %s1922_s22  }
  0x43   : > { %p346_p0 = scmp.lt.s32.totalorder %s345_s15, 11  ;;  %1550 = vmatpush3.msra.mxu0 %v366_v0  ;;  %v497_v5 = vld [vmem:[#allocation3 + $0x10] sm:$0xff]  ;;  %v363_v6 = vld [vmem:[#allocation6] sm:$0xff]  ;;  %1566 = vmatprep.subr.mxu1 %v498_v4  ;;  %v496_v7 = vld [vmem:[#allocation3 + $0x8] sm:$0xff]  ;;  %s1428_s18 = sshll.u32 %s330_s16, 6 }
  0x44   : > { %s2290_s17 = smov (!%p335_p13, %s1429_s17), 3  ;;  %1551 = vmatprep.subr.mxu0 %v365_v1  ;;  %1567 = vmatpush3.msra.mxu1 %v498_v4  ;;  %v495_v10 = vld [vmem:[#allocation3] sm:$0xff]  ;;  %s1945_s8 = smov [#allocation9]  }
  0x45   : > { %s2288_s15 = smov (!%p346_p0, %s345_s15), 11  ;;  %s1484_s12 = sshll.u32 %s2290_s17, 5  ;;  %1552 = vmatpush3.msra.mxu0 %v365_v1  ;;  %1568 = vmatprep.subr.mxu1 %v497_v5 }
  0x46   : > { %s1432_s11 = sshll.u32 %s2288_s15, 3  ;;  %1553 = vmatprep.subr.mxu0 %v364_v3  ;;  %s2102_s14 = scalar_lea.vmem %s2267_s0, %s1484_s12  ;;  %1569 = vmatpush3.msra.mxu1 %v497_v5 }
  0x47   : > { %s2095_s30 = scalar_lea.vmem %s2268_s1, %s1432_s11  ;;  %1554 = vmatpush3.msra.mxu0 %v364_v3  ;;  %1570 = vmatprep.subr.mxu1 %v496_v7  ;;  %v487_v11 = vld [vmem:[%s2102_s14] sm:$0xff]  ;;  %v488_v12 = vld [vmem:[%s2102_s14 + $0x8] sm:$0xff]  ;;  %v489_v14 = vld [vmem:[%s2102_s14 + $0x10] sm:$0xff]  ;;  %s332_s15 = scalar_lea.vmem [#allocation9], %s1428_s18 }
  0x48   : > { %v357_v2 = vld [vmem:[%s2095_s30] sm:$0xff]  ;;  %v358_v8 = vld [vmem:[%s2095_s30 + $0x8] sm:$0xff]  ;;  %1555 = vmatprep.subr.mxu0 %v363_v6  ;;  %v359_v9 = vld [vmem:[%s2095_s30 + $0x10] sm:$0xff]  ;;  %1571 = vmatpush3.msra.mxu1 %v496_v7  ;;  %s1295_s17 = sshll.u32 %s332_s15, 4  ;;  %s1486_s11 = sshll.u32 %s1930_s24, 10  ;;  %s2213_s17 = int_to_ptr.vmem [resolvable:$true] %s1295_s17 }
  0x49   : > { %1557 = vmatprep.mubr.msk.f32.mxu0 %vm367_vm0, %v357_v2  ;;  %1556 = vmatpush3.msra.mxu0 %v363_v6  ;;  %v360_v13 = vld [vmem:[%s2095_s30 + $0x18] sm:$0xff]  ;;  %v361_v15 = vld [vmem:[%s2095_s30 + $0x20] sm:$0xff]  ;;  %v362_v17 = vld [vmem:[%s2095_s30 + $0x28] sm:$0xff]  ;;  %s2218_s30 = scalar_lea.hbm %s2273_s6, %s1486_s11  ;;  %s2222_s12 = scalar_lea.sflag [#allocation5], %s330_s16 }
  0x4a   : > { %1558 = vmatmul.mubr.msk.f32.vlgmr.msra.gmra.mxu0 %vm367_vm0, %v358_v8  ;;  %1572 = vmatprep.subr.mxu1 %v495_v10  ;;  %v490_v16 = vld [vmem:[%s2102_s14 + $0x18] sm:$0xff]  ;;  %v491_v18 = vld [vmem:[%s2102_s14 + $0x20] sm:$0xff]  ;;  %v492_v19 = vld [vmem:[%s2102_s14 + $0x28] sm:$0xff]  ;;  %s1854_s24 = scalar_lea.vmem %s2213_s17, 1024  ;;  %s1858_s13 = sshll.u32 %s1945_s8, 4  ;;  %s1859_s13 = int_to_ptr.vmem [resolvable:$false] %s1858_s13 }
  0x4b   : > { %1560 = vmatprep.mubr.msk.f32.mxu0 %vm367_vm0, %v359_v9  ;;  %1573 = vmatpush3.msra.mxu1 %v495_v10  ;;  %v493_v20 = vld [vmem:[%s2102_s14 + $0x30] sm:$0xff]  ;;  %v494_v21 = vld [vmem:[%s2102_s14 + $0x38] sm:$0xff]  ;;  %p1855_p10 = scmp.ne.s32.totalorder %s2213_s17, %s1854_s24  ;;  %s1860_s14 = scalar_lea.vmem %s1859_s13, 2048 }
  0x4c   : > { %1574 = vmatprep.mubr.msk.f32.mxu1 %vm367_vm0, %v487_v11  ;;  %p1861_p6 = scmp.lt.s32.totalorder %s2213_s17, %s1859_s13  ;;  %p1862_p7 = scmp.lt.s32.totalorder %s1860_s14, %s1854_s24 }
  0x4d   : > { %1575 = vmatmul.mubr.msk.f32.vlgmr.msra.gmra.mxu1 %vm367_vm0, %v488_v12  ;;  %p1856_p11 = pnand %p1855_p10, %p2023_p4 }
  0x4e   : > { %1561 = vmatmul.mubr.msk.f32.gmra.mxu0 %vm367_vm0, %v360_v13  ;;  %1577 = vmatprep.mubr.msk.f32.mxu1 %vm367_vm0, %v489_v14  ;;  %p1863_p9 = por %p1862_p7, %p1861_p6 }
  0x4f   : > { %1563 = vmatprep.mubr.msk.f32.mxu0 %vm367_vm0, %v361_v15  ;;  %p1857_p3 = pneg %p1856_p11 }
  0x51   : > { %1578 = vmatmul.mubr.msk.f32.gmra.mxu1 %vm367_vm0, %v490_v16  ;;  %p1864_p12 = pnand %p1863_p9, %p1857_p3 }
  0x52   : > { %1564 = vmatmul.mubr.msk.f32.gmra.mxu0 %vm367_vm0, %v362_v17  ;;  %1580 = vmatprep.mubr.msk.f32.mxu1 %vm367_vm0, %v491_v18 }
  0x55   : > { %1581 = vmatmul.mubr.msk.f32.gmra.mxu1 %vm367_vm0, %v492_v19 }
  0x56   : > { %1583 = vmatprep.mubr.msk.f32.mxu1 %vm367_vm0, %v493_v20 }
  0x59   : > { %1584 = vmatmul.mubr.msk.f32.gmra.mxu1 %vm367_vm0, %v494_v21 }
 0x10a   : > { %v1559_v22 = vpop.f32.mrf.mxu0 }
 0x10b   : > { %482 = vst.msk [vmem:[#allocation2 + $0x8] sm:$0xff] %vm367_vm0, %v1559_v22 }
 0x10c   : > { %v452_v23 = vpop.f32.mrf.mxu0 }
 0x10d   : > { %481 = vst.msk [vmem:[#allocation2] sm:$0xff] %vm367_vm0, %v452_v23  ;;  %v1576_v24 = vpop.f32.mrf.mxu1 }
 0x10e   : > { %v1562_v25 = vpop.f32.mrf.mxu0 }
 0x10f   : > { %484 = vst.msk [vmem:[#allocation2 + $0x18] sm:$0xff] %vm367_vm0, %v1562_v25  ;;  %v590_v26 = vpop.f32.mrf.mxu1 }
 0x110   : > { %v462_v27 = vpop.f32.mrf.mxu0  ;;  %1592 = vmatprep.mubr.msk.f32.mxu0 %vm367_vm0, %v590_v26 }
 0x111   : > { %483 = vst.msk [vmem:[#allocation2 + $0x10] sm:$0xff] %vm367_vm0, %v462_v27  ;;  %v1579_v28 = vpop.f32.mrf.mxu1 }
 0x112   : > { %v1565_v29 = vpop.f32.mrf.mxu0  ;;  %v630_v35 = vld [vmem:[#allocation2 + $0x8] sm:$0xff] }
 0x113   : > { %486 = vst.msk [vmem:[#allocation2 + $0x28] sm:$0xff] %vm367_vm0, %v1565_v29  ;;  %v600_v30 = vpop.f32.mrf.mxu1 }
 0x114   : > { %v472_v31 = vpop.f32.mrf.mxu0  ;;  %v629_v38 = vld [vmem:[#allocation2] sm:$0xff] }
 0x115   : > { %485 = vst.msk [vmem:[#allocation2 + $0x20] sm:$0xff] %vm367_vm0, %v472_v31  ;;  %v1582_v32 = vpop.f32.mrf.mxu1 }
 0x116   : > { %v2155_v39 = vld [vmem:[#allocation2 + $0x18] sm:$0xff] }
 0x117   : > { %v610_v33 = vpop.f32.mrf.mxu1 }
 0x118   : > { %v631_v34 = vld [vmem:[#allocation2 + $0x10] sm:$0xff]  ;;  %1604 = vmatprep.mubr.msk.f32.mxu1 %vm367_vm0, %v610_v33 }
 0x119   : > { %1586 = vmatprep.subr.msk.mxu0 %vm367_vm0, %v631_v34  ;;  %v1585_v40 = vpop.f32.mrf.mxu1 }
 0x11a   : > { %1587 = vmatpush3.xpose.msk.msra.mxu0 %vm367_vm0, %v631_v34  ;;  %v2140_v36 = vld [vmem:[#allocation2 + $0x28] sm:$0xff] }
 0x11b   : > { %1588 = vmatprep.subr.msk.mxu0 %vm367_vm0, %v630_v35  ;;  %1598 = vmatprep.subr.msk.mxu1 %vm367_vm0, %v2140_v36  ;;  %v620_v41 = vpop.f32.mrf.mxu1 }
 0x11c   : > { %1599 = vmatpush3.xpose.msk.msra.mxu1 %vm367_vm0, %v2140_v36  ;;  %v2147_v37 = vld [vmem:[#allocation2 + $0x20] sm:$0xff] }
 0x11d   : > { %1600 = vmatprep.subr.msk.mxu1 %vm367_vm0, %v2147_v37 }
 0x11e   : > { %1589 = vmatpush3.xpose.msk.msra.mxu0 %vm367_vm0, %v630_v35 }
 0x11f   : > { %1590 = vmatprep.subr.msk.mxu0 %vm367_vm0, %v629_v38 }
 0x120   : > { %1601 = vmatpush3.xpose.msk.msra.mxu1 %vm367_vm0, %v2147_v37 }
 0x121   : > { %1602 = vmatprep.subr.msk.mxu1 %vm367_vm0, %v2155_v39 }
 0x122   : > { %1591 = vmatpush3.xpose.msk.msra.mxu0 %vm367_vm0, %v629_v38 }
 0x124   : > { %1603 = vmatpush3.xpose.msk.msra.mxu1 %vm367_vm0, %v2155_v39 }
 0x125   : > { %1593 = vmatmul.mubr.msk.f32.vlgmr.msra.gmra.mxu0 %vm367_vm0, %v1576_v24  ;;  %1610 = vmatprep.subr.mxu1 %v631_v34 }
 0x126   : > { %1595 = vmatprep.mubr.msk.f32.mxu0 %vm367_vm0, %v600_v30 }
 0x127   : > { %1605 = vmatmul.mubr.msk.f32.vlgmr.msra.gmra.mxu1 %vm367_vm0, %v1582_v32 }
 0x128   : > { %1611 = vmatpush3.msra.mxu1 %v631_v34  ;;  %1607 = vmatprep.mubr.msk.f32.mxu1 %vm367_vm0, %v620_v41  ;;  %v1133_v34 = vld [vmem:[#allocation8 + $0x18] sm:$0xff] }
 0x129   : > { %1596 = vmatmul.mubr.msk.f32.gmra.mxu0 %vm367_vm0, %v1579_v28  ;;  %1612 = vmatprep.subr.mxu1 %v630_v35 }
 0x12a   : > { %1613 = vmatpush3.msra.mxu1 %v630_v35  ;;  %1634 = vmatprep.subr.mxu0 %v1133_v34  ;;  %v1132_v35 = vld [vmem:[#allocation8 + $0x10] sm:$0xff] }
 0x12b   : > { %1614 = vmatprep.subr.mxu1 %v629_v38  ;;  %1608 = vmatmul.mubr.msk.f32.gmra.mxu1 %vm367_vm0, %v1585_v40 }
 0x12c   : > { %1615 = vmatpush3.msra.mxu1 %v629_v38  ;;  %1635 = vmatpush3.msra.mxu0 %v1133_v34 }
 0x12d   : > { %1622 = vmatprep.subr.mxu1 %v2140_v36  ;;  %1636 = vmatprep.subr.mxu0 %v1132_v35 }
 0x12e   : > { %1637 = vmatpush3.msra.mxu0 %v1132_v35 }
 0x1e5   : > { %v1594_v42 = vpop.f32.mrf.mxu0 }
 0x1e6   : > { %v851_v49 = vsel %vm847_vm1, %v1594_v42, -inf }
 0x1e7   : > { %v722_v43 = vpop.f32.mrf.mxu0  ;;  %v1606_v44 = vpop.f32.mrf.mxu1 }
 0x1e8   : > { %v848_v45 = vsel %vm847_vm1, %v722_v43, -inf  ;;  %v863_v55 = vsel %vm847_vm1, %v1606_v44, -inf }
 0x1e9   : > { %849 = vmax.xlane.f32.xlu0 %v848_v45  ;;  %v1597_v46 = vpop.f32.mrf.mxu0  ;;  %v828_v47 = vpop.f32.mrf.mxu1 }
 0x1ea   : > { %v857_v52 = vsel %vm847_vm1, %v1597_v46, -inf  ;;  %v860_v53 = vsel %vm847_vm1, %v828_v47, -inf }
 0x1eb   : > { %v732_v48 = vpop.f32.mrf.mxu0  ;;  %v1609_v51 = vpop.f32.mrf.mxu1 }
 0x1ec   : > { %v854_v50 = vsel %vm847_vm1, %v732_v48, -inf  ;;  %v869_v57 = vsel %vm847_vm1, %v1609_v51, -inf }
 0x1ed   : > { %852 = vmax.xlane.f32.xlu0 %v851_v49  ;;  %855 = vmax.xlane.f32.xlu1 %v854_v50  ;;  %v838_v54 = vpop.f32.mrf.mxu1 }
 0x1ee   : > { %v866_v56 = vsel %vm847_vm1, %v838_v54, -inf }
 0x1f1   : > { %858 = vmax.xlane.f32.xlu1 %v857_v52  ;;  %861 = vmax.xlane.f32.xlu0 %v860_v53 }
 0x1f5   : > { %864 = vmax.xlane.f32.xlu1 %v863_v55  ;;  %867 = vmax.xlane.f32.xlu0 %v866_v56 }
 0x1f9   : > { %870 = vmax.xlane.f32.xlu1 %v869_v57 }
 0x272   : > { %v850_v58 = vpop.xlane.xlu0 %849 }
 0x273   : > { %v872_v59 = vsub.f32 %v722_v43, %v850_v58 }
 0x275   : > { %v880_v60 = vmul.f32 1.442695, %v872_v59 }
 0x276   : > { %v853_v61 = vpop.xlane.xlu0 %852  ;;  %v856_v62 = vpop.xlane.xlu1 %855 }
 0x277   : > { %1744 = vpow2.f32 %v880_v60  ;;  %v873_v63 = vsub.f32 %v1594_v42, %v853_v61  ;;  %v874_v0 = vsub.f32 %v732_v48, %v856_v62 }
 0x279   : > { %v882_v1 = vmul.f32 1.442695, %v873_v63  ;;  %v884_v2 = vmul.f32 1.442695, %v874_v0 }
 0x27a   : > { %v859_v3 = vpop.xlane.xlu1 %858  ;;  %v862_v4 = vpop.xlane.xlu0 %861 }
 0x27b   : > { %1746 = vpow2.f32 %v882_v1  ;;  %v875_v5 = vsub.f32 %v1597_v46, %v859_v3  ;;  %v876_v6 = vsub.f32 %v828_v47, %v862_v4 }
 0x27c   : > { %1748 = vpow2.f32 %v884_v2 }
 0x27d   : > { %v886_v7 = vmul.f32 1.442695, %v875_v5  ;;  %v888_v8 = vmul.f32 1.442695, %v876_v6  ;;  %v1469_v6 = vld [vmem:[%s2272_s5] ss:$0 sm:$0xff] }
 0x27e   : > { %v865_v9 = vpop.xlane.xlu1 %864  ;;  %v868_v10 = vpop.xlane.xlu0 %867 }
 0x27f   : > { %1750 = vpow2.f32 %v886_v7  ;;  %v877_v11 = vsub.f32 %v1606_v44, %v865_v9  ;;  %v878_v12 = vsub.f32 %v838_v54, %v868_v10 }
 0x280   : > { %1752 = vpow2.f32 %v888_v8 }
 0x281   : > { %v890_v13 = vmul.f32 1.442695, %v877_v11  ;;  %v892_v14 = vmul.f32 1.442695, %v878_v12 }
 0x282   : > { %v871_v15 = vpop.xlane.xlu1 %870 }
 0x283   : > { %1754 = vpow2.f32 %v890_v13  ;;  %v879_v16 = vsub.f32 %v1609_v51, %v871_v15 }
 0x284   : > { %v1745_v17 = vpop.eup %1744  ;;  %1756 = vpow2.f32 %v892_v14 }
 0x285   : > { %v894_v18 = vmul.f32 1.442695, %v879_v16  ;;  %1616 = vmatprep.mubr.msk.f32.mxu1 %vm847_vm1, %v1745_v17  ;;  %v896_v19 = vsel %vm847_vm1, %v1745_v17, 0.0 }
 0x286   : > { %897 = vadd.xlane.f32.xlu0 %v896_v19 }
 0x287   : > { %1758 = vpow2.f32 %v894_v18 }
 0x288   : > { %v1747_v20 = vpop.eup %1746 }
 0x289   : > { %v1749_v21 = vpop.eup %1748  ;;  %1617 = vmatmul.mubr.msk.f32.vlgmr.msra.gmra.mxu1 %vm847_vm1, %v1747_v20  ;;  %v899_v22 = vsel %vm847_vm1, %v1747_v20, 0.0 }
 0x28a   : > { %1623 = vmatpush3.msra.mxu1 %v2140_v36  ;;  %1619 = vmatprep.mubr.msk.f32.mxu1 %vm847_vm1, %v1749_v21  ;;  %v902_v23 = vsel %vm847_vm1, %v1749_v21, 0.0  ;;  %v1131_v36 = vld [vmem:[#allocation8 + $0x8] sm:$0xff] }
 0x28b   : > { %1624 = vmatprep.subr.mxu1 %v2147_v37  ;;  %900 = vadd.xlane.f32.xlu1 %v899_v22 }
 0x28c   : > { %v1751_v24 = vpop.eup %1750  ;;  %903 = vadd.xlane.f32.xlu0 %v902_v23  ;;  %1625 = vmatpush3.msra.mxu1 %v2147_v37  ;;  %v1130_v37 = vld [vmem:[#allocation8] sm:$0xff] }
 0x28d   : > { %v1753_v25 = vpop.eup %1752  ;;  %1626 = vmatprep.subr.mxu1 %v2155_v39  ;;  %1620 = vmatmul.mubr.msk.f32.gmra.mxu1 %vm847_vm1, %v1751_v24  ;;  %v905_v26 = vsel %vm847_vm1, %v1751_v24, 0.0 }
 0x28e   : > { %1627 = vmatpush3.msra.mxu1 %v2155_v39  ;;  %1628 = vmatprep.mubr.msk.f32.mxu1 %vm847_vm1, %v1753_v25  ;;  %v908_v27 = vsel %vm847_vm1, %v1753_v25, 0.0 }
 0x28f   : > { %906 = vadd.xlane.f32.xlu1 %v905_v26  ;;  %1638 = vmatprep.subr.mxu0 %v1131_v36 }
 0x290   : > { %v1755_v28 = vpop.eup %1754  ;;  %909 = vadd.xlane.f32.xlu0 %v908_v27  ;;  %1639 = vmatpush3.msra.mxu0 %v1131_v36 }
 0x291   : > { %v1757_v29 = vpop.eup %1756  ;;  %1629 = vmatmul.mubr.msk.f32.vlgmr.msra.gmra.mxu1 %vm847_vm1, %v1755_v28  ;;  %v911_v30 = vsel %vm847_vm1, %v1755_v28, 0.0  ;;  %1640 = vmatprep.subr.mxu0 %v1130_v37 }
 0x292   : > { %1631 = vmatprep.mubr.msk.f32.mxu1 %vm847_vm1, %v1757_v29  ;;  %v914_v31 = vsel %vm847_vm1, %v1757_v29, 0.0  ;;  %1641 = vmatpush3.msra.mxu0 %v1130_v37 }
 0x293   : > { %912 = vadd.xlane.f32.xlu1 %v911_v30 }
 0x294   : > { %v1759_v32 = vpop.eup %1758  ;;  %915 = vadd.xlane.f32.xlu0 %v914_v31 }
 0x295   : > { %1632 = vmatmul.mubr.msk.f32.gmra.mxu1 %vm847_vm1, %v1759_v32  ;;  %v917_v33 = vsel %vm847_vm1, %v1759_v32, 0.0 }
 0x297   : > { %918 = vadd.xlane.f32.xlu1 %v917_v33 }
 0x30f   : > { %v898_v38 = vpop.xlane.xlu0 %897 }
 0x310   : > { %1760 = vrcp.f32 %v898_v38 }
 0x314   : > { %v901_v39 = vpop.xlane.xlu1 %900 }
 0x315   : > { %v904_v40 = vpop.xlane.xlu0 %903  ;;  %1762 = vrcp.f32 %v901_v39 }
 0x316   : > { %1764 = vrcp.f32 %v904_v40 }
 0x318   : > { %v907_v41 = vpop.xlane.xlu1 %906 }
 0x319   : > { %v910_v42 = vpop.xlane.xlu0 %909  ;;  %1766 = vrcp.f32 %v907_v41 }
 0x31a   : > { %1768 = vrcp.f32 %v910_v42 }
 0x31c   : > { %v913_v43 = vpop.xlane.xlu1 %912 }
 0x31d   : > { %1770 = vrcp.f32 %v913_v43  ;;  %v916_v44 = vpop.xlane.xlu0 %915  ;;  %v1761_v47 = vpop.eup %1760 }
 0x31e   : > { %1772 = vrcp.f32 %v916_v44 }
 0x320   : > { %v919_v45 = vpop.xlane.xlu1 %918 }
 0x321   : > { %1774 = vrcp.f32 %v919_v45 }
 0x322   : > { %v1763_v49 = vpop.eup %1762 }
 0x323   : > { %v1765_v53 = vpop.eup %1764 }
 0x326   : > { %v1767_v55 = vpop.eup %1766 }
 0x327   : > { %v1769_v59 = vpop.eup %1768 }
 0x32a   : > { %v1771_v61 = vpop.eup %1770 }
 0x32b   : > { %v1773_v1 = vpop.eup %1772 }
 0x32e   : > { %v1775_v3 = vpop.eup %1774 }
 0x349   : > { %v1618_v46 = vpop.f32.mrf.mxu1 }
 0x34a   : > { %v1123_v51 = vmul.f32 %v1763_v49, %v1618_v46 }
 0x34b   : > { %v998_v48 = vpop.f32.mrf.mxu1 }
 0x34c   : > { %v1122_v50 = vmul.f32 %v1761_v47, %v998_v48 }
 0x34d   : > { %v1621_v52 = vpop.f32.mrf.mxu1 }
 0x34e   : > { %1642 = vmatprep.mubr.msk.f32.mxu0 %vm367_vm0, %v1122_v50  ;;  %v1125_v57 = vmul.f32 %v1767_v55, %v1621_v52 }
 0x34f   : > { %v1008_v54 = vpop.f32.mrf.mxu1  ;;  %1643 = vmatmul.mubr.msk.f32.vlgmr.msra.gmra.mxu0 %vm367_vm0, %v1123_v51 }
 0x350   : > { %v1124_v56 = vmul.f32 %v1765_v53, %v1008_v54 }
 0x351   : > { %v1630_v58 = vpop.f32.mrf.mxu1 }
 0x352   : > { %1645 = vmatprep.mubr.msk.f32.mxu0 %vm367_vm0, %v1124_v56  ;;  %v1127_v63 = vmul.f32 %v1771_v61, %v1630_v58 }
 0x353   : > { %v1095_v60 = vpop.f32.mrf.mxu1  ;;  %1646 = vmatmul.mubr.msk.f32.gmra.mxu0 %vm367_vm0, %v1125_v57 }
 0x354   : > { %v1126_v62 = vmul.f32 %v1769_v59, %v1095_v60 }
 0x355   : > { %v1633_v0 = vpop.f32.mrf.mxu1 }
 0x356   : > { %1648 = vmatprep.mubr.msk.f32.mxu0 %vm367_vm0, %v1126_v62  ;;  %v1129_v5 = vmul.f32 %v1775_v3, %v1633_v0 }
 0x357   : > { %v1105_v2 = vpop.f32.mrf.mxu1  ;;  %1649 = vmatmul.mubr.msk.f32.gmra.mxu0 %vm367_vm0, %v1127_v63 }
 0x358   : > { %v1128_v4 = vmul.f32 %v1773_v1, %v1105_v2 }
 0x35a   : > { %1651 = vmatprep.mubr.msk.f32.mxu0 %vm367_vm0, %v1128_v4 }
 0x35b   : > { %1652 = vmatmul.mubr.msk.f32.gmra.mxu0 %vm367_vm0, %v1129_v5 }
 0x40f   : > { %v1644_v7 = vpop.f32.mrf.mxu0 }
 0x410   : > { %v1237_v8 = vadd.f32 %v1644_v7, %v1469_v6 }
 0x411   : > { %v1231_v9 = vpop.f32.mrf.mxu0 }
 0x412   : > { %1271 = vst [vmem:[%s332_s15 + $0x8] sm:$0xff] %v1237_v8  ;;  %v1232_v10 = vadd.f32 %v1469_v6, %v1231_v9 }
 0x413   : > { %v1647_v11 = vpop.f32.mrf.mxu0 }
 0x414   : > { %1270 = vst [vmem:[%s332_s15] sm:$0xff] %v1232_v10  ;;  %v1247_v12 = vadd.f32 %v1647_v11, %v1469_v6 }
 0x415   : > { %v1241_v13 = vpop.f32.mrf.mxu0 }
 0x416   : > { %1273 = vst [vmem:[%s332_s15 + $0x18] sm:$0xff] %v1247_v12  ;;  %v1242_v14 = vadd.f32 %v1469_v6, %v1241_v13 }
 0x417   : > { %v1650_v15 = vpop.f32.mrf.mxu0 }
 0x418   : > { %1272 = vst [vmem:[%s332_s15 + $0x10] sm:$0xff] %v1242_v14  ;;  %v1257_v16 = vadd.f32 %v1650_v15, %v1469_v6 }
 0x419   : > { %v1251_v17 = vpop.f32.mrf.mxu0 }
 0x41a   : > { %1275 = vst [vmem:[%s332_s15 + $0x28] sm:$0xff] %v1257_v16  ;;  %v1252_v18 = vadd.f32 %v1469_v6, %v1251_v17 }
 0x41b   : > { %v1653_v19 = vpop.f32.mrf.mxu0 }
 0x41c   : > { %1274 = vst [vmem:[%s332_s15 + $0x20] sm:$0xff] %v1252_v18  ;;  %v1267_v20 = vadd.f32 %v1653_v19, %v1469_v6 }
 0x41d   : > { %v1261_v21 = vpop.f32.mrf.mxu0 }
 0x41e   : > { %1277 = vst [vmem:[%s332_s15 + $0x38] sm:$0xff] %v1267_v20  ;;  %v1262_v22 = vadd.f32 %v1469_v6, %v1261_v21 }
 0x420   : > { %1276 = vst [vmem:[%s332_s15 + $0x30] sm:$0xff] %v1262_v22 }
 0x421   : > { %1867 = shalt.err (!%p1864_p12)
}
 0x422   : > { %s1868_s16 = scalar_lea.hbm %s2218_s30, 1024  ;;  %s1872_s28 = scalar_lea.hbm %s2273_s6, 2048 }
 0x423   : > { %p1869_p1 = scmp.ne.s32.totalorder %s2218_s30, %s1868_s16  ;;  %p1873_p5 = scmp.lt.s32.totalorder %s2218_s30, %s2273_s6 }
 0x424   : > { %p1874_p13 = scmp.lt.s32.totalorder %s1872_s28, %s1868_s16 }
 0x425   : > { %p1870_p8 = pnand %p1869_p1, %p2023_p4 }
 0x426   : > { %p1875_p0 = por %p1874_p13, %p1873_p5 }
 0x427   : > { %p1871_p2 = pneg %p1870_p8 }
 0x429   : > { %p1876_p10 = pnand %p1875_p0, %p1871_p2 }
 0x42b   : > { %1879 = shalt.err (!%p1876_p10)
}
 0x42c   : > { %s1946_s19 = smov 128   ;;  %s1947_s20 = smov 8  }
 0x42d   : > { %1666 = dma.vmem_to_hbm [thread:$0]  (%p2023_p4), %s2213_s17, 1024, %s2218_s30, %s2222_s12, %s1946_s19, %s1946_s19, %s1947_s20  }
 0x42e PF: > { %p1688_p11 = scmp.ge.s32.totalorder %s1938_s26, 2  ;;  %s1310_s24 = sand.u32 1, %s1918_s21  }
 0x42f   : > { %p2279_p3 = scmp.ne.s32.totalorder %s2275_s9, 0  ;;  %s1311_s8 = scalar_lea.sflag [#allocation5], %s1310_s24 }
 0x431   : > { %p1679_p6 = pnand %p1688_p11, %p2279_p3 }
 0x433   : > { %p1680_p7 = pneg %p1679_p6 }
 0x435   : > { %1913 = dma.done.wait (%p1680_p7), %s1311_s8, 1024  }
 0x436   : > { %1915 = vsyncadd (%p1680_p7), %s1311_s8, 4294966272  ;;  %s21_s26 = sadd.s32 1, %s1938_s26   ;;  %s2280_s21 = smov %s1922_s22 }
 0x437   : > { %p18_p9 = scmp.ge.s32.totalorder %s21_s26, 4   ;;  %s2281_s22 = smov %s1926_s23 }
 0x438   : > { %s2282_s23 = smov %s2036_s10  ;;  %s2283_s24 = smov %s1934_s25 }
 0x439   : > { %s2284_s25 = smov %s2286_s29  ;;  %20 = sbr.rel (!%p18_p9) target bundleno = 6 (0x6), region = 99 }
 0x43e   :  { %1316 = vsyncpa [#allocation4], 1 }
 0x43f   :  { %1318 = vsyncpa [#allocation4 + $0x1], 1 }
 0x440   :  { %1319 = vsyncpa [#allocation7], 1 }
 0x441   :  { %1320 = vsyncpa [#allocation5], 1 }
 0x442   :  { %1322 = vsyncpa [#allocation5 + $0x1], 1 }

</bundles_post_ra>
